<compile_context>
chip_gen: v7x
topology: tpu7x:2x2x1
jax: 0.10.0
libtpu: 0.0.40
codegen_flags: <defaults>
</compile_context>

<pallas_src>
import functools

import jax
import jax.numpy as jnp
from jax.experimental import pallas as pl
from jax.experimental.pallas import tpu as pltpu


def _spp_kernel(x_ref, m_ref, s_ref, feat_ref):
    # x_ref: (TM, HW); m_ref: (HW, L) 0/1 indicator; s_ref: (1, L) f32 scale.
    acc = jnp.dot(x_ref[...], m_ref[...], preferred_element_type=jnp.float32)
    feat_ref[...] = (acc * s_ref[...]).astype(feat_ref.dtype)


def _pool_matrix(H, W, M, dtype):
    """0/1 indicator matrix (H*W, L) + f32 per-column averaging scale (1, L).

    One matmul with the indicator yields the concat([1x1, 2x2, 4x4]) bin *sums*;
    multiplying by `scale` converts sums to means (exactly, in f32).
    """
    bh, bw = H // 4, W // 4
    hw = jnp.arange(H * W)
    h, w = hw // W, hw % W
    k4 = (h // bh) * 4 + (w // bw)              # which 4x4 cell each pixel is in
    k2 = (h // (2 * bh)) * 2 + (w // (2 * bw))  # which 2x2 cell each pixel is in

    m4 = jax.nn.one_hot(k4, 16, dtype=jnp.float32)   # (HW, 16)
    m2 = jax.nn.one_hot(k2, 4, dtype=jnp.float32)    # (HW, 4)
    m1 = jnp.ones((H * W, 1), dtype=jnp.float32)     # (HW, 1)

    if M == "[1,2,4]":
        m_ind = jnp.concatenate([m1, m2, m4], axis=1)            # (HW, 21)
        counts = jnp.concatenate([
            jnp.full((1,), H * W, dtype=jnp.float32),
            jnp.full((4,), (H * W) // 4, dtype=jnp.float32),
            jnp.full((16,), bh * bw, dtype=jnp.float32),
        ])
    else:  # "[1,2]"
        m_ind = jnp.concatenate([m1, m2], axis=1)                 # (HW, 5)
        counts = jnp.concatenate([
            jnp.full((1,), H * W, dtype=jnp.float32),
            jnp.full((4,), (H * W) // 4, dtype=jnp.float32),
        ])
    scale = (1.0 / counts).reshape(1, -1)                         # (1, L) f32
    # 0/1 entries are exact in any dtype (incl. bf16 / fp8).
    return m_ind.astype(dtype), scale


def _round_up(x, m):
    return ((x + m - 1) // m) * m


def _vmem_capacity_bytes():
    try:
        cap = int(pltpu.get_tpu_info().vmem_capacity_bytes)
        if cap > 0:
            return cap
    except Exception:
        pass
    return 64 * 1024 * 1024  # conservative default (v7x per-TC VMEM)


@functools.partial(jax.jit, static_argnames=("M",))
def spp_forward(x, M="[1,2,4]"):
    """x: (N, C, H, W) with H % 4 == 0, W % 4 == 0.

    Returns (x_feature, x_strength) matching the PyTorch SPP module:
      x_feature:  (N, C, L) with L = 21 for M='[1,2,4]', L = 5 for M='[1,2]'
      x_strength: (L, N)
    """
    if M not in ("[1,2,4]", "[1,2]"):
        raise NotImplementedError("ERROR M")
    N, C, H, W = x.shape
    assert H % 4 == 0 and W % 4 == 0, "exact block adaptive pooling only"
    # TODO(synk): general AdaptiveAvgPool2d bins (H, W not divisible by 4) not implemented.

    L = 21 if M == "[1,2,4]" else 5
    HW = H * W
    R = N * C

    # Keep input dtype (no extra HBM->HBM cast pass); f32 accumulation on the MXU.
    x_flat = x.reshape(R, HW)
    itemsize = jnp.dtype(x_flat.dtype).itemsize
    m_ind, scale = _pool_matrix(H, W, M, x_flat.dtype)

    # ---- Tile sizing (VMEM-aware, lane/sublane-padded accounting) ----
    sub = max(8, 32 // itemsize)          # sublane tile: 8 f32, 16 bf16, 32 int8/fp8
    hw_lanes = _round_up(HW, 128)         # lane padding of the x tile
    # Per-row VMEM bytes of one buffered row-tile row: x row + lane-padded out row.
    row_bytes = (hw_lanes + 128) * itemsize

    vmem_cap = _vmem_capacity_bytes()     # 128 MiB (v5e/v6e), 64 MiB (v7x per TC)
    # Budget ~1/4 of VMEM for the double-buffered row tiles:
    #   v6e/v5e -> ~16 MiB x-tile per buffer, v7x -> ~8 MiB per buffer.
    tile_budget = vmem_cap // 4
    max_rows = max(sub, (tile_budget // (2 * row_bytes)) // sub * sub)

    r_sub = _round_up(R, sub)
    # >= 2 grid steps when R allows (shards the 'parallel' axis over v7x's 2 TCs),
    # and never a tile that overshoots R by more than the 8-row sublane remainder.
    tm = max(8, min(max_rows,
                    _round_up(pl.cdiv(r_sub, 2), sub),
                    _round_up(R, 8)))
    grid = (pl.cdiv(R, tm),)              # ragged last block, no input padding

    # Explicit VMEM limit with padded layouts + headroom, clamped to 90% of physical.
    m_rows = _round_up(HW, sub)
    vmem_bytes = (2 * tm * hw_lanes * itemsize        # x tiles (double-buffered)
                  + 2 * tm * 128 * itemsize           # out tiles (lane-padded to 128)
                  + 2 * m_rows * 128 * itemsize       # 0/1 pool matrix
                  + 2 * 8 * 128 * 4                   # f32 scale row, (8,128)-padded
                  + (4 << 20))                        # headroom
    vmem_bytes = int(min(max(vmem_bytes, 8 << 20), (vmem_cap * 9) // 10))

    feat_flat = pl.pallas_call(
        _spp_kernel,
        out_shape=jax.ShapeDtypeStruct((R, L), x.dtype),
        grid_spec=pltpu.PrefetchScalarGridSpec(
            num_scalar_prefetch=0,
            grid=grid,
            in_specs=[
                pl.BlockSpec((tm, HW), lambda i: (i, 0)),
                pl.BlockSpec((HW, L), lambda i: (0, 0)),
                pl.BlockSpec((1, L), lambda i: (0, 0)),
            ],
            out_specs=pl.BlockSpec((tm, L), lambda i: (i, 0)),
        ),
        compiler_params=pltpu.CompilerParams(
            dimension_semantics=("parallel",),
            vmem_limit_bytes=vmem_bytes),
    )(x_flat, m_ind, scale)

    feat = feat_flat.reshape(N, C, L)
    # x_strength = mean over channels of x_feature.permute(2, 0, 1) -> (L, N).
    # Tiny (N*L elements); done in XLA so row-tiling the kernel stays trivially correct.
    strength = feat.mean(axis=1).T
    return feat, strength


def _reference_spp(x, M="[1,2,4]"):
    """Pure-JAX reference for correctness checking."""
    N, C, H, W = x.shape
    bh, bw = H // 4, W // 4
    x44 = x.reshape(N, C, 4, bh, 4, bw).mean(axis=(3, 5))            # (N,C,4,4)
    x22 = x44.reshape(N, C, 2, 2, 2, 2).mean(axis=(3, 5))            # (N,C,2,2)
    x11 = x44.mean(axis=(2, 3), keepdims=True)                       # (N,C,1,1)
    f44 = x44.reshape(N, C, 16)
    f22 = x22.reshape(N, C, 4)
    f11 = x11.reshape(N, C, 1)
    if M == "[1,2,4]":
        feat = jnp.concatenate([f11, f22, f44], axis=2)
    else:
        feat = jnp.concatenate([f11, f22], axis=2)
    strength = jnp.transpose(feat, (2, 0, 1)).mean(axis=2)
    return feat, strength


if __name__ == "__main__":
    M = "[1,2,4]"
    print(M)  # mirrors the print(self.M) in SPP.__init__
    key = jax.random.PRNGKey(0)
    x = jax.random.normal(key, (2, 4, 16, 16), dtype=jnp.float32)

    feat, strength = spp_forward(x, M=M)
    jax.block_until_ready((feat, strength))

    ref_feat, ref_strength = _reference_spp(x, M=M)
    assert feat.shape == (2, 4, 21) and strength.shape == (21, 2)
    assert jnp.allclose(feat, ref_feat, atol=1e-5, rtol=1e-5)
    assert jnp.allclose(strength, ref_strength, atol=1e-5, rtol=1e-5)

    # '[1,2]' branch + a row count (3*5=15) that exercises the ragged last block.
    x2 = jax.random.normal(jax.random.PRNGKey(1), (3, 5, 8, 8), dtype=jnp.float32)
    f2, s2 = spp_forward(x2, M="[1,2]")
    rf2, rs2 = _reference_spp(x2, M="[1,2]")
    jax.block_until_ready((f2, s2))
    assert f2.shape == (3, 5, 5) and s2.shape == (5, 3)
    assert jnp.allclose(f2, rf2, atol=1e-5, rtol=1e-5)
    assert jnp.allclose(s2, rs2, atol=1e-5, rtol=1e-5)

    # bf16 path: exact 0/1 indicator + f32 scale keeps pooling at f32 precision.
    x3 = jax.random.normal(jax.random.PRNGKey(2), (2, 4, 16, 16),
                           dtype=jnp.float32).astype(jnp.bfloat16)
    f3, s3 = spp_forward(x3, M="[1,2,4]")
    jax.block_until_ready((f3, s3))
    rf3, _ = _reference_spp(x3.astype(jnp.float32), M="[1,2,4]")
    assert f3.dtype == jnp.bfloat16 and f3.shape == (2, 4, 21)
    assert jnp.allclose(f3.astype(jnp.float32), rf3, atol=1e-2, rtol=1e-2)

    print("KERNEL_OK")
</pallas_src>

<mosaic_0001>
module attributes {stable_mosaic.version = 11 : i64} {
  func.func @_spp_kernel(%arg0: i32, %arg1: memref<8x256xf32, #tpu.memory_space<vmem>>, %arg2: memref<256x21xf32, #tpu.memory_space<vmem>>, %arg3: memref<1x21xf32, #tpu.memory_space<vmem>>, %arg4: memref<8x21xf32, #tpu.memory_space<vmem>>) attributes {dimension_semantics = [#tpu.dimension_semantics<parallel>], iteration_bounds = array<i64: 1>, scalar_prefetch = 0 : i64, scratch_operands = 0 : i64, tpu.core_type = #tpu.core_type<tc>, window_params = [{transform_indices = @transform_0, window_bounds = array<i64: 8, 256>}, {pipeline_mode = #tpu.pipeline_mode<synchronous>, transform_indices = @transform_1, window_bounds = array<i64: 256, 21>}, {pipeline_mode = #tpu.pipeline_mode<synchronous>, transform_indices = @transform_2, window_bounds = array<i64: 1, 21>}, {transform_indices = @transform_3, window_bounds = array<i64: 8, 21>}]} {
    %c0 = arith.constant 0 : index
    %c0_0 = arith.constant 0 : index
    %0 = vector.load %arg1[%c0, %c0_0] : memref<8x256xf32, #tpu.memory_space<vmem>>, vector<8x256xf32>
    %c0_1 = arith.constant 0 : index
    %c0_2 = arith.constant 0 : index
    %1 = vector.load %arg2[%c0_1, %c0_2] : memref<256x21xf32, #tpu.memory_space<vmem>>, vector<256x21xf32>
    %cst = arith.constant dense<0.000000e+00> : vector<8x21xf32>
    %2 = tpu.matmul %0, %1, %cst {dimension_numbers = #tpu.dot_dimension_numbers<[1], [0], [0], [1], [0, 0, 1, 1], [], []>} : vector<8x256xf32>, vector<256x21xf32>, vector<8x21xf32> -> vector<8x21xf32>
    %c0_3 = arith.constant 0 : index
    %c0_4 = arith.constant 0 : index
    %3 = vector.load %arg3[%c0_3, %c0_4] : memref<1x21xf32, #tpu.memory_space<vmem>>, vector<1x21xf32>
    %4 = vector.broadcast %3 : vector<1x21xf32> to vector<8x21xf32>
    %5 = arith.mulf %2, %4 : vector<8x21xf32>
    %c0_5 = arith.constant 0 : index
    %c0_6 = arith.constant 0 : index
    %6 = vector.load %arg4[%c0_5, %c0_6] : memref<8x21xf32, #tpu.memory_space<vmem>>, vector<8x21xf32>
    tpu.vector_store %arg4[%c0_5, %c0_6], %5 {strides = array<i32>} : memref<8x21xf32, #tpu.memory_space<vmem>>, vector<8x21xf32>,
    return
  }
  func.func @transform_0(%arg0: i32) -> (i32, i32) {
    %c0_i32 = arith.constant 0 : i32
    %c0_i32_0 = arith.constant 0 : i32
    return %arg0, %c0_i32 : i32, i32
  }
  func.func @transform_1(%arg0: i32) -> (i32, i32) {
    %c0_i32 = arith.constant 0 : i32
    %c0_i32_0 = arith.constant 0 : i32
    %c0_i32_1 = arith.constant 0 : i32
    return %c0_i32, %c0_i32_0 : i32, i32
  }
  func.func @transform_2(%arg0: i32) -> (i32, i32) {
    %c0_i32 = arith.constant 0 : i32
    %c0_i32_0 = arith.constant 0 : i32
    %c0_i32_1 = arith.constant 0 : i32
    return %c0_i32, %c0_i32_0 : i32, i32
  }
  func.func @transform_3(%arg0: i32) -> (i32, i32) {
    %c0_i32 = arith.constant 0 : i32
    %c0_i32_0 = arith.constant 0 : i32
    return %arg0, %c0_i32 : i32, i32
  }
}

</mosaic_0001>

<bundles_post_ra>
// kernel: spp_forward.1
= control target key start
LH: loop header
LB: loop body
LE: loop exit
PB: predicated region body
PF: predicated region fallthrough
CT: control target
= control target key end

     0   :  { %vm126_vm0 = vcmask 171008   ;;  %s328_s1 = inlined_call_operand.vmem [shape: f32[256,21], index: 1, kind: input, shape index: {}]   ;;  %s329_s0 = inlined_call_operand.vmem [shape: f32[8,256], index: 0, kind: input, shape index: {}]   ;;  %s330_s2 = inlined_call_operand.vmem [shape: f32[1,21], index: 2, kind: input, shape index: {}]   ;;  %s331_s3 = inlined_call_operand.vmem [shape: f32[8,21], index: 3, kind: output, shape index: {}]  }
   0x1   :  { %v32_v0 = vld [vmem:[%s328_s1 + $0x80] sm:$0xff]  ;;  %v33_v1 = vld [vmem:[%s328_s1 + $0x88] sm:$0xff]  ;;  %v34_v5 = vld [vmem:[%s328_s1 + $0x90] sm:$0xff] }
   0x2   :  { %v16_v2 = vld [vmem:[%s328_s1] sm:$0xff]  ;;  %v168_v3 = vpack.c.bf16 %v33_v1, %v32_v0  ;;  %v17_v4 = vld [vmem:[%s328_s1 + $0x8] sm:$0xff]  ;;  %v35_v6 = vld [vmem:[%s328_s1 + $0x98] sm:$0xff] }
   0x3   :  { %v170_v7 = vpack.c.bf16 %v17_v4, %v16_v2  ;;  %v172_v8 = vpack.c.bf16 %v35_v6, %v34_v5  ;;  %v18_v9 = vld [vmem:[%s328_s1 + $0x10] sm:$0xff]  ;;  %v19_v10 = vld [vmem:[%s328_s1 + $0x18] sm:$0xff]  ;;  %v36_v11 = vld [vmem:[%s328_s1 + $0xa0] sm:$0xff] }
   0x4   :  { %169 = vmatprep.subr.bf16.mxu0 %v168_v3  ;;  %v37_v12 = vld [vmem:[%s328_s1 + $0xa8] sm:$0xff]  ;;  %v174_v13 = vpack.c.bf16 %v19_v10, %v18_v9  ;;  %v20_v15 = vld [vmem:[%s328_s1 + $0x20] sm:$0xff]  ;;  %v38_v17 = vld [vmem:[%s328_s1 + $0xb0] sm:$0xff] }
   0x5   :  { %171 = vmatpush3.bf16.msra.mxu0 %v170_v7  ;;  %v176_v14 = vpack.c.bf16 %v37_v12, %v36_v11  ;;  %v21_v16 = vld [vmem:[%s328_s1 + $0x28] sm:$0xff]  ;;  %v39_v18 = vld [vmem:[%s328_s1 + $0xb8] sm:$0xff]  ;;  %v22_v21 = vld [vmem:[%s328_s1 + $0x30] sm:$0xff] }
   0x6   :  { %173 = vmatprep.subr.bf16.mxu0 %v172_v8  ;;  %v178_v19 = vpack.c.bf16 %v21_v16, %v20_v15  ;;  %v180_v20 = vpack.c.bf16 %v39_v18, %v38_v17  ;;  %v23_v22 = vld [vmem:[%s328_s1 + $0x38] sm:$0xff]  ;;  %v40_v23 = vld [vmem:[%s328_s1 + $0xc0] sm:$0xff]  ;;  %v41_v24 = vld [vmem:[%s328_s1 + $0xc8] sm:$0xff] }
   0x7   :  { %v15_v25 = vld [vmem:[%s329_s0 + $0x8] sm:$0xff]  ;;  %v182_v26 = vpack.c.bf16 %v23_v22, %v22_v21  ;;  %v184_v27 = vpack.c.bf16 %v41_v24, %v40_v23  ;;  %v24_v28 = vld [vmem:[%s328_s1 + $0x40] sm:$0xff]  ;;  %v42_v30 = vld [vmem:[%s328_s1 + $0xd0] sm:$0xff] }
   0x8   :  { %112 = vmatprep.mubr.f32.mxu0 %v15_v25  ;;  %v25_v29 = vld [vmem:[%s328_s1 + $0x48] sm:$0xff]  ;;  %v43_v31 = vld [vmem:[%s328_s1 + $0xd8] sm:$0xff]  ;;  %v26_v34 = vld [vmem:[%s328_s1 + $0x50] sm:$0xff] }
   0x9   :  { %175 = vmatpush3.bf16.msra.mxu0 %v174_v13  ;;  %v186_v32 = vpack.c.bf16 %v25_v29, %v24_v28  ;;  %v188_v33 = vpack.c.bf16 %v43_v31, %v42_v30  ;;  %v27_v35 = vld [vmem:[%s328_s1 + $0x58] sm:$0xff]  ;;  %v44_v36 = vld [vmem:[%s328_s1 + $0xe0] sm:$0xff]  ;;  %v45_v37 = vld [vmem:[%s328_s1 + $0xe8] sm:$0xff] }
   0xa   :  { %177 = vmatprep.subr.bf16.mxu0 %v176_v14  ;;  %v190_v38 = vpack.c.bf16 %v27_v35, %v26_v34  ;;  %v192_v39 = vpack.c.bf16 %v45_v37, %v44_v36  ;;  %v28_v40 = vld [vmem:[%s328_s1 + $0x60] sm:$0xff]  ;;  %v29_v41 = vld [vmem:[%s328_s1 + $0x68] sm:$0xff]  ;;  %v46_v42 = vld [vmem:[%s328_s1 + $0xf0] sm:$0xff] }
   0xb   :  { %v47_v43 = vld [vmem:[%s328_s1 + $0xf8] sm:$0xff]  ;;  %v194_v44 = vpack.c.bf16 %v29_v41, %v28_v40  ;;  %v30_v46 = vld [vmem:[%s328_s1 + $0x70] sm:$0xff]  ;;  %v14_v49 = vld [vmem:[%s329_s0] sm:$0xff] }
   0xc   :  { %v196_v45 = vpack.c.bf16 %v47_v43, %v46_v42  ;;  %v31_v47 = vld [vmem:[%s328_s1 + $0x78] sm:$0xff]  ;;  %v132_v52 = vld [vmem:[%s330_s2] ss:$0 sm:$0xff] }
   0xd   :  { %179 = vmatpush3.bf16.msra.mxu0 %v178_v19  ;;  %v198_v48 = vpack.c.bf16 %v31_v47, %v30_v46 }
   0xe   :  { %181 = vmatprep.subr.bf16.mxu0 %v180_v20 }
  0x11   :  { %183 = vmatpush3.bf16.msra.mxu0 %v182_v26 }
  0x12   :  { %185 = vmatprep.subr.bf16.mxu0 %v184_v27 }
  0x15   :  { %187 = vmatpush3.bf16.msra.mxu0 %v186_v32 }
  0x16   :  { %189 = vmatprep.subr.bf16.mxu0 %v188_v33 }
  0x19   :  { %191 = vmatpush3.bf16.msra.mxu0 %v190_v38 }
  0x1a   :  { %193 = vmatprep.subr.bf16.mxu0 %v192_v39 }
  0x1d   :  { %195 = vmatpush3.bf16.msra.mxu0 %v194_v44 }
  0x1e   :  { %197 = vmatprep.subr.bf16.mxu0 %v196_v45 }
  0x21   :  { %199 = vmatpush3.bf16.msra.mxu0 %v198_v48 }
  0x24   :  { %113 = vmatmul.mubr.f32.vlgmr.msra.gmra.mrb[0].mxu0 %v14_v49 }
  0xf7   :  { %v165_v50 = vpop.f32.mrb[0].mxu0 }
  0xf8   :  { %v166_v51 = vpop.f32.mrb[1].mxu0 }
  0xf9   :  { %v167_v53 = vadd.f32 %v166_v51, %v165_v50 }
  0xfb   :  { %v125_v54 = vmul.f32 %v167_v53, %v132_v52 }
  0xfd   :  { %127 = vst.msk [vmem:[%s331_s3] sm:$0xff] %vm126_vm0, %v125_v54 }

</bundles_post_ra>
